<compile_context>
chip_gen: v6e
topology: v6e:2x2x1
jax: 0.10.0
libtpu: 0.0.40
codegen_flags: <defaults>
</compile_context>

<pallas_src>
import math

import jax
import jax.numpy as jnp
import numpy as np
from jax.experimental import pallas as pl
from jax.experimental.pallas import tpu as pltpu

BN_EPS = 1e-5
_INV_SQRT2 = 1.0 / math.sqrt(2.0)


def _gelu_kernel(x):
    """Exact (erf-based) GELU, Abramowitz & Stegun 7.1.26 (|err| ~1.5e-7).

    VALU-lean: abs/sign handled with bit ops, the divide moved to the EUP via
    pl.reciprocal(approx=True) + one Newton refinement.
    """
    a1, a2, a3, a4, a5 = (0.254829592, -0.284496736, 1.421413741,
                          -1.453152027, 1.061405429)
    p = 0.3275911

    z = x * _INV_SQRT2
    zb = pltpu.bitcast(z, jnp.uint32)
    az = pltpu.bitcast(zb & jnp.uint32(0x7FFFFFFF), jnp.float32)   # |z|
    sign = zb & jnp.uint32(0x80000000)

    d = 1.0 + p * az
    r = pl.reciprocal(d, approx=True)
    t = r * (2.0 - d * r)                          # one Newton step
    poly = ((((a5 * t + a4) * t + a3) * t + a2) * t + a1) * t
    erf_abs = 1.0 - poly * jnp.exp(-(az * az))     # erf(|z|) in [0, 1)
    erf = pltpu.bitcast(pltpu.bitcast(erf_abs, jnp.uint32) | sign, jnp.float32)
    return 0.5 * x * (1.0 + erf)


def mlp_kernel(x_ref,
               w1_ref, b1_ref,      # BN1 folded in
               w2_ref, b2_ref,      # BN2 folded in
               w3_ref, b3_ref,
               w4_ref, b4_ref,      # w4 as (1, 64) row, b4 as (1, 1)
               o_ref):
    x = x_ref[...]

    # Linear(input_dim, 256) [+ folded BatchNorm1d(256)] + GELU
    h = _gelu_kernel(jnp.dot(x, w1_ref[...],
                             preferred_element_type=jnp.float32) + b1_ref[...])
    # TODO(synk): Dropout(0.3) / Dropout(0.2) are eval-mode identities here
    # (training-mode stochastic masking intentionally omitted).

    # Linear(256, 128) [+ folded BatchNorm1d(128)] + GELU
    h = _gelu_kernel(jnp.dot(h, w2_ref[...],
                             preferred_element_type=jnp.float32) + b2_ref[...])

    # Linear(128, 64) + GELU
    h = _gelu_kernel(jnp.dot(h, w3_ref[...],
                             preferred_element_type=jnp.float32) + b3_ref[...])

    # Linear(64, 1), computed transposed: (1,64) x (tm,64)^T -> (1, tm) so the
    # output tile is lane-dense (unmasked full-lane stores).  Same contraction
    # pattern as q @ k^T, handled natively by the MXU lowering.
    out_t = jax.lax.dot_general(w4_ref[...], h,
                                (((1,), (1,)), ((), ())),
                                preferred_element_type=jnp.float32)
    o_ref[0] = out_t + b4_ref[...]


def fold_params(params):
    """Fold eval-mode BatchNorm (+ bias) into the adjacent Linear weights."""
    (w1, b1, g1, be1, m1, v1,
     w2, b2, g2, be2, m2, v2,
     w3, b3, w4, b4) = params
    s1 = g1 * jax.lax.rsqrt(v1 + BN_EPS)
    w1f = w1 * s1
    b1f = (b1 - m1) * s1 + be1
    s2 = g2 * jax.lax.rsqrt(v2 + BN_EPS)
    w2f = w2 * s2
    b2f = (b2 - m2) * s2 + be2
    w4r = w4.T                      # (64,1) -> (1,64) row for transposed dot
    b4s = b4.reshape(1, 1)
    return (w1f, b1f, w2f, b2f, w3, b3, w4r, b4s)


def mlp_forward(x, params, tm=2048):
    n, d = x.shape
    folded = fold_params(params)

    # Batch tile: large to amortize the ~0.35us per-grid-step overhead and
    # keep the (small-K) MXU pipeline full, but capped at ~ceil(N/2) rounded
    # to the 8-row sublane granule so (a) v7x's 2 TensorCores both get a grid
    # step and (b) small/mid batches don't pay for up to tm-1 padded rows.
    half = max(8, pl.cdiv(pl.cdiv(n, 2), 8) * 8)
    tm = int(max(8, min(tm, half)))
    num_tiles = pl.cdiv(n, tm)

    h1, h2, h3 = folded[0].shape[1], folded[2].shape[1], folded[4].shape[1]
    flops = 2 * num_tiles * tm * (d * h1 + h1 * h2 + h2 * h3 + h3)
    transcendentals = num_tiles * tm * (h1 + h2 + h3)   # one exp per GELU elem
    bytes_accessed = 4 * (n * d + n + sum(int(p.size) for p in folded))

    def wspec(p):
        # Resident parameter: constant block index across the batch grid, so
        # it is DMA'd once and never re-fetched.
        return pl.BlockSpec(p.shape, lambda i: (0, 0))

    out_t = pl.pallas_call(
        mlp_kernel,
        out_shape=jax.ShapeDtypeStruct((num_tiles, 1, tm), jnp.float32),
        grid=(num_tiles,),
        in_specs=[pl.BlockSpec((tm, d), lambda i: (i, 0))]
                 + [wspec(p) for p in folded],
        out_specs=pl.BlockSpec((1, 1, tm), lambda i: (i, 0, 0)),
        compiler_params=pltpu.CompilerParams(
            dimension_semantics=("parallel",),
            vmem_limit_bytes=32 * 1024 * 1024),
        cost_estimate=pl.CostEstimate(flops=flops,
                                      transcendentals=transcendentals,
                                      bytes_accessed=bytes_accessed),
    )(x, *folded)

    # (num_tiles, 1, tm) row-major == batch order -> (N, 1).  Rows >= N of the
    # ragged last tile are garbage (partial input block) and are sliced off;
    # every op in the kernel is row-local so they never contaminate valid rows.
    return out_t.reshape(num_tiles * tm, 1)[:n]


def mlp_reference(x, params):
    (w1, b1, g1, be1, m1, v1,
     w2, b2, g2, be2, m2, v2,
     w3, b3, w4, b4) = params

    def bn(h, g, be, m, v):
        return (h - m) * (g * jax.lax.rsqrt(v + BN_EPS)) + be

    h = jax.nn.gelu(bn(x @ w1 + b1, g1, be1, m1, v1), approximate=False)
    h = jax.nn.gelu(bn(h @ w2 + b2, g2, be2, m2, v2), approximate=False)
    h = jax.nn.gelu(h @ w3 + b3, approximate=False)
    return h @ w4 + b4


def init_params(key, input_dim):
    """Deterministic synthetic parameters matching the nn.Module shapes."""
    def linear(key, d_in, d_out):
        kw, kb = jax.random.split(key)
        bound = 1.0 / math.sqrt(d_in)
        w = jax.random.uniform(kw, (d_in, d_out), jnp.float32, -bound, bound)
        b = jax.random.uniform(kb, (1, d_out), jnp.float32, -bound, bound)
        return w, b

    def batchnorm(key, d):
        kg, kb, km, kv = jax.random.split(key, 4)
        gamma = jax.random.uniform(kg, (1, d), jnp.float32, 0.5, 1.5)
        beta = 0.1 * jax.random.normal(kb, (1, d), jnp.float32)
        mean = 0.1 * jax.random.normal(km, (1, d), jnp.float32)
        var = jax.random.uniform(kv, (1, d), jnp.float32, 0.5, 1.5)
        return gamma, beta, mean, var

    k1, k2, k3, k4, kbn1, kbn2 = jax.random.split(key, 6)
    w1, b1 = linear(k1, input_dim, 256)
    g1, be1, m1, v1 = batchnorm(kbn1, 256)
    w2, b2 = linear(k2, 256, 128)
    g2, be2, m2, v2 = batchnorm(kbn2, 128)
    w3, b3 = linear(k3, 128, 64)
    w4, b4 = linear(k4, 64, 1)
    return (w1, b1, g1, be1, m1, v1,
            w2, b2, g2, be2, m2, v2,
            w3, b3, w4, b4)


if __name__ == "__main__":
    key = jax.random.PRNGKey(0)
    k_x, k_p = jax.random.split(key)

    batch, input_dim = 8, 32
    x = jax.random.normal(k_x, (batch, input_dim), jnp.float32)
    params = init_params(k_p, input_dim)

    out = jax.block_until_ready(mlp_forward(x, params))
    ref = mlp_reference(x, params)
    assert out.shape == (batch, 1), out.shape
    np.testing.assert_allclose(np.asarray(out), np.asarray(ref),
                               rtol=1e-5, atol=1e-5)

    # Ragged batch (not a tile multiple): exercises the in-kernel partial-block
    # path that replaced the host-side jnp.pad.
    x2 = jax.random.normal(k_x, (13, input_dim), jnp.float32)
    out2 = jax.block_until_ready(mlp_forward(x2, params))
    ref2 = mlp_reference(x2, params)
    np.testing.assert_allclose(np.asarray(out2), np.asarray(ref2),
                               rtol=1e-5, atol=1e-5)

    print("KERNEL_OK")
</pallas_src>

<mosaic_0001>
module attributes {stable_mosaic.version = 11 : i64} {
  func.func @mlp_kernel(%arg0: i32, %arg1: memref<8x32xf32, #tpu.memory_space<vmem>>, %arg2: memref<32x256xf32, #tpu.memory_space<vmem>>, %arg3: memref<1x256xf32, #tpu.memory_space<vmem>>, %arg4: memref<256x128xf32, #tpu.memory_space<vmem>>, %arg5: memref<1x128xf32, #tpu.memory_space<vmem>>, %arg6: memref<128x64xf32, #tpu.memory_space<vmem>>, %arg7: memref<1x64xf32, #tpu.memory_space<vmem>>, %arg8: memref<1x64xf32, #tpu.memory_space<vmem>>, %arg9: memref<1x1xf32, #tpu.memory_space<vmem>>, %arg10: memref<1x1x8xf32, #tpu.memory_space<vmem>>) attributes {dimension_semantics = [#tpu.dimension_semantics<parallel>], iteration_bounds = array<i64: 1>, scalar_prefetch = 0 : i64, scratch_operands = 0 : i64, tpu.core_type = #tpu.core_type<tc>, window_params = [{transform_indices = @transform_0, window_bounds = array<i64: 8, 32>}, {pipeline_mode = #tpu.pipeline_mode<synchronous>, transform_indices = @transform_1, window_bounds = array<i64: 32, 256>}, {pipeline_mode = #tpu.pipeline_mode<synchronous>, transform_indices = @transform_2, window_bounds = array<i64: 1, 256>}, {pipeline_mode = #tpu.pipeline_mode<synchronous>, transform_indices = @transform_3, window_bounds = array<i64: 256, 128>}, {pipeline_mode = #tpu.pipeline_mode<synchronous>, transform_indices = @transform_4, window_bounds = array<i64: 1, 128>}, {pipeline_mode = #tpu.pipeline_mode<synchronous>, transform_indices = @transform_5, window_bounds = array<i64: 128, 64>}, {pipeline_mode = #tpu.pipeline_mode<synchronous>, transform_indices = @transform_6, window_bounds = array<i64: 1, 64>}, {pipeline_mode = #tpu.pipeline_mode<synchronous>, transform_indices = @transform_7, window_bounds = array<i64: 1, 64>}, {pipeline_mode = #tpu.pipeline_mode<synchronous>, transform_indices = @transform_8, window_bounds = array<i64: 1, 1>}, {transform_indices = @transform_9, window_bounds = array<i64: 1, 1, 8>}]} {
    %c0 = arith.constant 0 : index
    %c0_0 = arith.constant 0 : index
    %0 = vector.load %arg1[%c0, %c0_0] : memref<8x32xf32, #tpu.memory_space<vmem>>, vector<8x32xf32>
    %c0_1 = arith.constant 0 : index
    %c0_2 = arith.constant 0 : index
    %1 = vector.load %arg2[%c0_1, %c0_2] : memref<32x256xf32, #tpu.memory_space<vmem>>, vector<32x256xf32>
    %cst = arith.constant dense<0.000000e+00> : vector<8x256xf32>
    %2 = tpu.matmul %0, %1, %cst {dimension_numbers = #tpu.dot_dimension_numbers<[1], [0], [0], [1], [0, 0, 1, 1], [], []>} : vector<8x32xf32>, vector<32x256xf32>, vector<8x256xf32> -> vector<8x256xf32>
    %c0_3 = arith.constant 0 : index
    %c0_4 = arith.constant 0 : index
    %3 = vector.load %arg3[%c0_3, %c0_4] : memref<1x256xf32, #tpu.memory_space<vmem>>, vector<1x256xf32>
    %4 = vector.broadcast %3 : vector<1x256xf32> to vector<8x256xf32>
    %5 = arith.addf %2, %4 : vector<8x256xf32>
    %cst_5 = arith.constant 0.707106769 : f32
    %6 = vector.broadcast %cst_5 : f32 to vector<8x256xf32>
    %7 = arith.mulf %5, %6 : vector<8x256xf32>
    %8 = tpu.bitcast %7 : vector<8x256xf32> -> vector<8x256xi32>
    %c2147483647_i32 = arith.constant 2147483647 : i32
    %9 = vector.broadcast %c2147483647_i32 : i32 to vector<8x256xi32>
    %10 = arith.andi %8, %9 : vector<8x256xi32>
    %11 = tpu.bitcast %10 : vector<8x256xi32> -> vector<8x256xf32>
    %c-2147483648_i32 = arith.constant -2147483648 : i32
    %12 = vector.broadcast %c-2147483648_i32 : i32 to vector<8x256xi32>
    %13 = arith.andi %8, %12 : vector<8x256xi32>
    %cst_6 = arith.constant 0.327591091 : f32
    %14 = vector.broadcast %cst_6 : f32 to vector<8x256xf32>
    %15 = arith.mulf %14, %11 : vector<8x256xf32>
    %cst_7 = arith.constant 1.000000e+00 : f32
    %16 = vector.broadcast %cst_7 : f32 to vector<8x256xf32>
    %17 = arith.addf %16, %15 : vector<8x256xf32>
    %18 = tpu.reciprocal %17 {approx = true} : vector<8x256xf32> -> vector<8x256xf32>
    %19 = arith.mulf %17, %18 : vector<8x256xf32>
    %cst_8 = arith.constant 2.000000e+00 : f32
    %20 = vector.broadcast %cst_8 : f32 to vector<8x256xf32>
    %21 = arith.subf %20, %19 : vector<8x256xf32>
    %22 = arith.mulf %18, %21 : vector<8x256xf32>
    %cst_9 = arith.constant 1.06140542 : f32
    %23 = vector.broadcast %cst_9 : f32 to vector<8x256xf32>
    %24 = arith.mulf %23, %22 : vector<8x256xf32>
    %cst_10 = arith.constant -1.45315206 : f32
    %25 = vector.broadcast %cst_10 : f32 to vector<8x256xf32>
    %26 = arith.addf %24, %25 : vector<8x256xf32>
    %27 = arith.mulf %26, %22 : vector<8x256xf32>
    %cst_11 = arith.constant 1.42141378 : f32
    %28 = vector.broadcast %cst_11 : f32 to vector<8x256xf32>
    %29 = arith.addf %27, %28 : vector<8x256xf32>
    %30 = arith.mulf %29, %22 : vector<8x256xf32>
    %cst_12 = arith.constant -0.284496725 : f32
    %31 = vector.broadcast %cst_12 : f32 to vector<8x256xf32>
    %32 = arith.addf %30, %31 : vector<8x256xf32>
    %33 = arith.mulf %32, %22 : vector<8x256xf32>
    %cst_13 = arith.constant 0.254829586 : f32
    %34 = vector.broadcast %cst_13 : f32 to vector<8x256xf32>
    %35 = arith.addf %33, %34 : vector<8x256xf32>
    %36 = arith.mulf %35, %22 : vector<8x256xf32>
    %37 = arith.mulf %11, %11 : vector<8x256xf32>
    %cst_14 = arith.constant 0.000000e+00 : f32
    %38 = vector.broadcast %cst_14 : f32 to vector<8x256xf32>
    %39 = arith.subf %38, %37 : vector<8x256xf32>
    %40 = math.exp %39 : vector<8x256xf32>
    %41 = arith.mulf %36, %40 : vector<8x256xf32>
    %cst_15 = arith.constant 1.000000e+00 : f32
    %42 = vector.broadcast %cst_15 : f32 to vector<8x256xf32>
    %43 = arith.subf %42, %41 : vector<8x256xf32>
    %44 = tpu.bitcast %43 : vector<8x256xf32> -> vector<8x256xi32>
    %45 = arith.ori %44, %13 : vector<8x256xi32>
    %46 = tpu.bitcast %45 : vector<8x256xi32> -> vector<8x256xf32>
    %cst_16 = arith.constant 5.000000e-01 : f32
    %47 = vector.broadcast %cst_16 : f32 to vector<8x256xf32>
    %48 = arith.mulf %47, %5 : vector<8x256xf32>
    %cst_17 = arith.constant 1.000000e+00 : f32
    %49 = vector.broadcast %cst_17 : f32 to vector<8x256xf32>
    %50 = arith.addf %49, %46 : vector<8x256xf32>
    %51 = arith.mulf %48, %50 : vector<8x256xf32>
    %c0_18 = arith.constant 0 : index
    %c0_19 = arith.constant 0 : index
    %52 = vector.load %arg4[%c0_18, %c0_19] : memref<256x128xf32, #tpu.memory_space<vmem>>, vector<256x128xf32>
    %cst_20 = arith.constant dense<0.000000e+00> : vector<8x128xf32>
    %53 = tpu.matmul %51, %52, %cst_20 {dimension_numbers = #tpu.dot_dimension_numbers<[1], [0], [0], [1], [0, 0, 1, 1], [], []>} : vector<8x256xf32>, vector<256x128xf32>, vector<8x128xf32> -> vector<8x128xf32>
    %c0_21 = arith.constant 0 : index
    %c0_22 = arith.constant 0 : index
    %54 = vector.load %arg5[%c0_21, %c0_22] : memref<1x128xf32, #tpu.memory_space<vmem>>, vector<1x128xf32>
    %55 = vector.broadcast %54 : vector<1x128xf32> to vector<8x128xf32>
    %56 = arith.addf %53, %55 : vector<8x128xf32>
    %cst_23 = arith.constant 0.707106769 : f32
    %57 = vector.broadcast %cst_23 : f32 to vector<8x128xf32>
    %58 = arith.mulf %56, %57 : vector<8x128xf32>
    %59 = tpu.bitcast %58 : vector<8x128xf32> -> vector<8x128xi32>
    %c2147483647_i32_24 = arith.constant 2147483647 : i32
    %60 = vector.broadcast %c2147483647_i32_24 : i32 to vector<8x128xi32>
    %61 = arith.andi %59, %60 : vector<8x128xi32>
    %62 = tpu.bitcast %61 : vector<8x128xi32> -> vector<8x128xf32>
    %c-2147483648_i32_25 = arith.constant -2147483648 : i32
    %63 = vector.broadcast %c-2147483648_i32_25 : i32 to vector<8x128xi32>
    %64 = arith.andi %59, %63 : vector<8x128xi32>
    %cst_26 = arith.constant 0.327591091 : f32
    %65 = vector.broadcast %cst_26 : f32 to vector<8x128xf32>
    %66 = arith.mulf %65, %62 : vector<8x128xf32>
    %cst_27 = arith.constant 1.000000e+00 : f32
    %67 = vector.broadcast %cst_27 : f32 to vector<8x128xf32>
    %68 = arith.addf %67, %66 : vector<8x128xf32>
    %69 = tpu.reciprocal %68 {approx = true} : vector<8x128xf32> -> vector<8x128xf32>
    %70 = arith.mulf %68, %69 : vector<8x128xf32>
    %cst_28 = arith.constant 2.000000e+00 : f32
    %71 = vector.broadcast %cst_28 : f32 to vector<8x128xf32>
    %72 = arith.subf %71, %70 : vector<8x128xf32>
    %73 = arith.mulf %69, %72 : vector<8x128xf32>
    %cst_29 = arith.constant 1.06140542 : f32
    %74 = vector.broadcast %cst_29 : f32 to vector<8x128xf32>
    %75 = arith.mulf %74, %73 : vector<8x128xf32>
    %cst_30 = arith.constant -1.45315206 : f32
    %76 = vector.broadcast %cst_30 : f32 to vector<8x128xf32>
    %77 = arith.addf %75, %76 : vector<8x128xf32>
    %78 = arith.mulf %77, %73 : vector<8x128xf32>
    %cst_31 = arith.constant 1.42141378 : f32
    %79 = vector.broadcast %cst_31 : f32 to vector<8x128xf32>
    %80 = arith.addf %78, %79 : vector<8x128xf32>
    %81 = arith.mulf %80, %73 : vector<8x128xf32>
    %cst_32 = arith.constant -0.284496725 : f32
    %82 = vector.broadcast %cst_32 : f32 to vector<8x128xf32>
    %83 = arith.addf %81, %82 : vector<8x128xf32>
    %84 = arith.mulf %83, %73 : vector<8x128xf32>
    %cst_33 = arith.constant 0.254829586 : f32
    %85 = vector.broadcast %cst_33 : f32 to vector<8x128xf32>
    %86 = arith.addf %84, %85 : vector<8x128xf32>
    %87 = arith.mulf %86, %73 : vector<8x128xf32>
    %88 = arith.mulf %62, %62 : vector<8x128xf32>
    %cst_34 = arith.constant 0.000000e+00 : f32
    %89 = vector.broadcast %cst_34 : f32 to vector<8x128xf32>
    %90 = arith.subf %89, %88 : vector<8x128xf32>
    %91 = math.exp %90 : vector<8x128xf32>
    %92 = arith.mulf %87, %91 : vector<8x128xf32>
    %cst_35 = arith.constant 1.000000e+00 : f32
    %93 = vector.broadcast %cst_35 : f32 to vector<8x128xf32>
    %94 = arith.subf %93, %92 : vector<8x128xf32>
    %95 = tpu.bitcast %94 : vector<8x128xf32> -> vector<8x128xi32>
    %96 = arith.ori %95, %64 : vector<8x128xi32>
    %97 = tpu.bitcast %96 : vector<8x128xi32> -> vector<8x128xf32>
    %cst_36 = arith.constant 5.000000e-01 : f32
    %98 = vector.broadcast %cst_36 : f32 to vector<8x128xf32>
    %99 = arith.mulf %98, %56 : vector<8x128xf32>
    %cst_37 = arith.constant 1.000000e+00 : f32
    %100 = vector.broadcast %cst_37 : f32 to vector<8x128xf32>
    %101 = arith.addf %100, %97 : vector<8x128xf32>
    %102 = arith.mulf %99, %101 : vector<8x128xf32>
    %c0_38 = arith.constant 0 : index
    %c0_39 = arith.constant 0 : index
    %103 = vector.load %arg6[%c0_38, %c0_39] : memref<128x64xf32, #tpu.memory_space<vmem>>, vector<128x64xf32>
    %cst_40 = arith.constant dense<0.000000e+00> : vector<8x64xf32>
    %104 = tpu.matmul %102, %103, %cst_40 {dimension_numbers = #tpu.dot_dimension_numbers<[1], [0], [0], [1], [0, 0, 1, 1], [], []>} : vector<8x128xf32>, vector<128x64xf32>, vector<8x64xf32> -> vector<8x64xf32>
    %c0_41 = arith.constant 0 : index
    %c0_42 = arith.constant 0 : index
    %105 = vector.load %arg7[%c0_41, %c0_42] : memref<1x64xf32, #tpu.memory_space<vmem>>, vector<1x64xf32>
    %106 = vector.broadcast %105 : vector<1x64xf32> to vector<8x64xf32>
    %107 = arith.addf %104, %106 : vector<8x64xf32>
    %cst_43 = arith.constant 0.707106769 : f32
    %108 = vector.broadcast %cst_43 : f32 to vector<8x64xf32>
    %109 = arith.mulf %107, %108 : vector<8x64xf32>
    %110 = tpu.bitcast %109 : vector<8x64xf32> -> vector<8x64xi32>
    %c2147483647_i32_44 = arith.constant 2147483647 : i32
    %111 = vector.broadcast %c2147483647_i32_44 : i32 to vector<8x64xi32>
    %112 = arith.andi %110, %111 : vector<8x64xi32>
    %113 = tpu.bitcast %112 : vector<8x64xi32> -> vector<8x64xf32>
    %c-2147483648_i32_45 = arith.constant -2147483648 : i32
    %114 = vector.broadcast %c-2147483648_i32_45 : i32 to vector<8x64xi32>
    %115 = arith.andi %110, %114 : vector<8x64xi32>
    %cst_46 = arith.constant 0.327591091 : f32
    %116 = vector.broadcast %cst_46 : f32 to vector<8x64xf32>
    %117 = arith.mulf %116, %113 : vector<8x64xf32>
    %cst_47 = arith.constant 1.000000e+00 : f32
    %118 = vector.broadcast %cst_47 : f32 to vector<8x64xf32>
    %119 = arith.addf %118, %117 : vector<8x64xf32>
    %120 = tpu.reciprocal %119 {approx = true} : vector<8x64xf32> -> vector<8x64xf32>
    %121 = arith.mulf %119, %120 : vector<8x64xf32>
    %cst_48 = arith.constant 2.000000e+00 : f32
    %122 = vector.broadcast %cst_48 : f32 to vector<8x64xf32>
    %123 = arith.subf %122, %121 : vector<8x64xf32>
    %124 = arith.mulf %120, %123 : vector<8x64xf32>
    %cst_49 = arith.constant 1.06140542 : f32
    %125 = vector.broadcast %cst_49 : f32 to vector<8x64xf32>
    %126 = arith.mulf %125, %124 : vector<8x64xf32>
    %cst_50 = arith.constant -1.45315206 : f32
    %127 = vector.broadcast %cst_50 : f32 to vector<8x64xf32>
    %128 = arith.addf %126, %127 : vector<8x64xf32>
    %129 = arith.mulf %128, %124 : vector<8x64xf32>
    %cst_51 = arith.constant 1.42141378 : f32
    %130 = vector.broadcast %cst_51 : f32 to vector<8x64xf32>
    %131 = arith.addf %129, %130 : vector<8x64xf32>
    %132 = arith.mulf %131, %124 : vector<8x64xf32>
    %cst_52 = arith.constant -0.284496725 : f32
    %133 = vector.broadcast %cst_52 : f32 to vector<8x64xf32>
    %134 = arith.addf %132, %133 : vector<8x64xf32>
    %135 = arith.mulf %134, %124 : vector<8x64xf32>
    %cst_53 = arith.constant 0.254829586 : f32
    %136 = vector.broadcast %cst_53 : f32 to vector<8x64xf32>
    %137 = arith.addf %135, %136 : vector<8x64xf32>
    %138 = arith.mulf %137, %124 : vector<8x64xf32>
    %139 = arith.mulf %113, %113 : vector<8x64xf32>
    %cst_54 = arith.constant 0.000000e+00 : f32
    %140 = vector.broadcast %cst_54 : f32 to vector<8x64xf32>
    %141 = arith.subf %140, %139 : vector<8x64xf32>
    %142 = math.exp %141 : vector<8x64xf32>
    %143 = arith.mulf %138, %142 : vector<8x64xf32>
    %cst_55 = arith.constant 1.000000e+00 : f32
    %144 = vector.broadcast %cst_55 : f32 to vector<8x64xf32>
    %145 = arith.subf %144, %143 : vector<8x64xf32>
    %146 = tpu.bitcast %145 : vector<8x64xf32> -> vector<8x64xi32>
    %147 = arith.ori %146, %115 : vector<8x64xi32>
    %148 = tpu.bitcast %147 : vector<8x64xi32> -> vector<8x64xf32>
    %cst_56 = arith.constant 5.000000e-01 : f32
    %149 = vector.broadcast %cst_56 : f32 to vector<8x64xf32>
    %150 = arith.mulf %149, %107 : vector<8x64xf32>
    %cst_57 = arith.constant 1.000000e+00 : f32
    %151 = vector.broadcast %cst_57 : f32 to vector<8x64xf32>
    %152 = arith.addf %151, %148 : vector<8x64xf32>
    %153 = arith.mulf %150, %152 : vector<8x64xf32>
    %c0_58 = arith.constant 0 : index
    %c0_59 = arith.constant 0 : index
    %154 = vector.load %arg8[%c0_58, %c0_59] : memref<1x64xf32, #tpu.memory_space<vmem>>, vector<1x64xf32>
    %cst_60 = arith.constant dense<0.000000e+00> : vector<1x8xf32>
    %155 = tpu.matmul %154, %153, %cst_60 {dimension_numbers = #tpu.dot_dimension_numbers<[1], [1], [0], [0], [0, 0, 1, 0], [], []>} : vector<1x64xf32>, vector<8x64xf32>, vector<1x8xf32> -> vector<1x8xf32>
    %c0_61 = arith.constant 0 : index
    %c0_62 = arith.constant 0 : index
    %156 = vector.load %arg9[%c0_61, %c0_62] : memref<1x1xf32, #tpu.memory_space<vmem>>, vector<1x1xf32>
    %157 = vector.broadcast %156 : vector<1x1xf32> to vector<1x8xf32>
    %158 = arith.addf %155, %157 : vector<1x8xf32>
    %c0_63 = arith.constant 0 : index
    %c0_64 = arith.constant 0 : index
    %c0_65 = arith.constant 0 : index
    %159 = vector.load %arg10[%c0_63, %c0_64, %c0_65] : memref<1x1x8xf32, #tpu.memory_space<vmem>>, vector<1x1x8xf32>
    %160 = vector.shape_cast %159 : vector<1x1x8xf32> to vector<1x8xf32>
    %161 = vector.shape_cast %158 : vector<1x8xf32> to vector<1x1x8xf32>
    tpu.vector_store %arg10[%c0_63, %c0_64, %c0_65], %161 {strides = array<i32>} : memref<1x1x8xf32, #tpu.memory_space<vmem>>, vector<1x1x8xf32>,
    return
  }
  func.func @transform_0(%arg0: i32) -> (i32, i32) {
    %c0_i32 = arith.constant 0 : i32
    %c0_i32_0 = arith.constant 0 : i32
    return %arg0, %c0_i32 : i32, i32
  }
  func.func @transform_1(%arg0: i32) -> (i32, i32) {
    %c0_i32 = arith.constant 0 : i32
    %c0_i32_0 = arith.constant 0 : i32
    %c0_i32_1 = arith.constant 0 : i32
    return %c0_i32, %c0_i32_0 : i32, i32
  }
  func.func @transform_2(%arg0: i32) -> (i32, i32) {
    %c0_i32 = arith.constant 0 : i32
    %c0_i32_0 = arith.constant 0 : i32
    %c0_i32_1 = arith.constant 0 : i32
    return %c0_i32, %c0_i32_0 : i32, i32
  }
  func.func @transform_3(%arg0: i32) -> (i32, i32) {
    %c0_i32 = arith.constant 0 : i32
    %c0_i32_0 = arith.constant 0 : i32
    %c0_i32_1 = arith.constant 0 : i32
    return %c0_i32, %c0_i32_0 : i32, i32
  }
  func.func @transform_4(%arg0: i32) -> (i32, i32) {
    %c0_i32 = arith.constant 0 : i32
    %c0_i32_0 = arith.constant 0 : i32
    %c0_i32_1 = arith.constant 0 : i32
    return %c0_i32, %c0_i32_0 : i32, i32
  }
  func.func @transform_5(%arg0: i32) -> (i32, i32) {
    %c0_i32 = arith.constant 0 : i32
    %c0_i32_0 = arith.constant 0 : i32
    %c0_i32_1 = arith.constant 0 : i32
    return %c0_i32, %c0_i32_0 : i32, i32
  }
  func.func @transform_6(%arg0: i32) -> (i32, i32) {
    %c0_i32 = arith.constant 0 : i32
    %c0_i32_0 = arith.constant 0 : i32
    %c0_i32_1 = arith.constant 0 : i32
    return %c0_i32, %c0_i32_0 : i32, i32
  }
  func.func @transform_7(%arg0: i32) -> (i32, i32) {
    %c0_i32 = arith.constant 0 : i32
    %c0_i32_0 = arith.constant 0 : i32
    %c0_i32_1 = arith.constant 0 : i32
    return %c0_i32, %c0_i32_0 : i32, i32
  }
  func.func @transform_8(%arg0: i32) -> (i32, i32) {
    %c0_i32 = arith.constant 0 : i32
    %c0_i32_0 = arith.constant 0 : i32
    %c0_i32_1 = arith.constant 0 : i32
    return %c0_i32, %c0_i32_0 : i32, i32
  }
  func.func @transform_9(%arg0: i32) -> (i32, i32, i32) {
    %c0_i32 = arith.constant 0 : i32
    %c0_i32_0 = arith.constant 0 : i32
    %c0_i32_1 = arith.constant 0 : i32
    return %arg0, %c0_i32, %c0_i32_0 : i32, i32, i32
  }
}

</mosaic_0001>

<bundles_post_ra>
// kernel: tpu_custom_call.1
= control target key start
LH: loop header
LB: loop body
LE: loop exit
PB: predicated region body
PF: predicated region fallthrough
CT: control target
= control target key end

     0   :  { %s928_s0 = inlined_call_operand.vmem [shape: f32[8,32], index: 0, kind: input, shape index: {}]   ;;  %s929_s1 = inlined_call_operand.vmem [shape: f32[32,256], index: 1, kind: input, shape index: {}]   ;;  %s930_s2 = inlined_call_operand.vmem [shape: f32[1,256], index: 2, kind: input, shape index: {}]   ;;  %s931_s3 = inlined_call_operand.hbm [shape: f32[256,128], index: 3, kind: input, shape index: {}]   ;;  %s932_s4 = inlined_call_operand.vmem [shape: f32[1,128], index: 4, kind: input, shape index: {}]   ;;  %s933_s5 = inlined_call_operand.vmem [shape: f32[128,64], index: 5, kind: input, shape index: {}]   ;;  %s934_s6 = inlined_call_operand.vmem [shape: f32[1,64], index: 6, kind: input, shape index: {}]   ;;  %s935_s7 = inlined_call_operand.vmem [shape: f32[1,64], index: 7, kind: input, shape index: {}]   ;;  %s936_s8 = inlined_call_operand.<no memory space> [shape: f32[1,1], index: 8, kind: input, shape index: {}]   ;;  %s937_s9 = inlined_call_operand.hbm [shape: f32[1,1,8], index: 9, kind: output, shape index: {}]  }
   0x1   :  { %v14_v0 = vstv %s936_s8 }
   0x2   :  { %15 = vst [vmem:[#allocation2] sm:$0x1] %v14_v0 }
   0x3   :  { %16 = vsyncpa [#allocation4], 0 }
   0x4   :  { %17 = vsyncpa [#allocation5], 0  ;;  %s747_s11 = smov [#allocation3]  }
   0x5   :  { %s29_s12 = sshll.u32 %s747_s11, 4  ;;  %s30_s12 = int_to_ptr.vmem [resolvable:$true] %s29_s12 }
   0x6   :  { %s711_s13 = scalar_lea.vmem %s30_s12, 4096  ;;  %p716_p1 = scmp.lt.s32.totalorder %s30_s12, %s30_s12 }
   0x7   :  { %p712_p0 = scmp.ne.s32.totalorder %s30_s12, %s711_s13  ;;  %p717_p2 = scmp.lt.s32.totalorder %s711_s13, %s711_s13 }
   0x9   :  { %p718_p3 = por %p717_p2, %p716_p1 }
   0xb   :  { %p719_p4 = pnand %p718_p3, %p712_p0 }
   0xd   :  { %722 = shalt.err (!%p719_p4)
}
   0xe   :  { %s748_s14 = smov 128   ;;  %s749_s15 = smov 8  }
   0xf   :  { %35 = dma.hbm_to_vmem [thread:$0]  %s931_s3, 4096, %s30_s12, [#allocation4], %s748_s14, %s748_s14, %s749_s15  }
  0x10   :  { %743 = dma.done.wait [#allocation4], 4096  }
  0x11   :  { %744 = vsyncadd [#allocation4], 4294963200  ;;  %v750_v1 = vmov 0.0   ;;  %v57_v2 = vld [vmem:[%s929_s1 + $0x38] sm:$0xff]  ;;  %v56_v3 = vld [vmem:[%s929_s1 + $0x30] sm:$0xff]  ;;  %vm70_vm0 = vcmask 261120   ;;  %v60_v43 = vlaneseq }
  0x12   :  { %138 = vmatprep.mubr.f32.mxu0 %v750_v1  ;;  %v55_v4 = vld [vmem:[%s929_s1 + $0x28] sm:$0xff]  ;;  %98 = vmatprep.subr.mxu0 %v57_v2  ;;  %v54_v5 = vld [vmem:[%s929_s1 + $0x20] sm:$0xff]  ;;  %v53_v6 = vld [vmem:[%s929_s1 + $0x18] sm:$0xff]  ;;  %vm751_vm1 = vmmov 0   ;;  %vm486_vm2 = vcmask 523264   ;;  %s753_s20 = smov [#allocation6]  }
  0x13   :  { %99 = vmatpush1.msra.mxu0 %v56_v3  ;;  %v52_v7 = vld [vmem:[%s929_s1 + $0x10] sm:$0xff]  ;;  %v51_v8 = vld [vmem:[%s929_s1 + $0x8] sm:$0xff]  ;;  %v50_v9 = vld [vmem:[%s929_s1] sm:$0xff]  ;;  %v840_v44 = vshrl.u32 %v60_v43, 7  ;;  %s571_s21 = sshll.u32 %s753_s20, 4  ;;  %vm563_vm3 = vcmask 57344   ;;  %s572_s21 = int_to_ptr.vmem [resolvable:$true] %s571_s21 }
  0x14   :  { %100 = vmatprep.subr.mxu0 %v55_v4  ;;  %v49_v10 = vld [vmem:[%s928_s0] sm:$0xff]  ;;  %v239_v13 = vld [vmem:[#allocation3 + $0xf0] sm:$0xff]  ;;  %v238_v15 = vld [vmem:[#allocation3 + $0xe8] sm:$0xff]  ;;  %s723_s22 = scalar_lea.vmem %s572_s21, 16  ;;  %s727_s23 = scalar_lea.vmem %s572_s21, 32 }
  0x15   :  { %101 = vmatpush1.msra.mxu0 %v54_v5  ;;  %v240_v11 = vld [vmem:[#allocation3 + $0xf8] sm:$0xff]  ;;  %v223_v14 = vld [vmem:[#allocation3 + $0x70] sm:$0xff]  ;;  %v222_v16 = vld [vmem:[#allocation3 + $0x68] sm:$0xff]  ;;  %v62_v45 = vsub.s32 0, %v840_v44  ;;  %v66_v47 = vsub.s32 1, %v840_v44  ;;  %p724_p5 = scmp.ne.s32.totalorder %s572_s21, %s723_s22  ;;  %p728_p6 = scmp.lt.s32.totalorder %s572_s21, %s572_s21 }
  0x16   :  { %102 = vmatprep.subr.mxu0 %v53_v6  ;;  %585 = vmatprep.subr.mxu1 %v240_v11  ;;  %v224_v12 = vld [vmem:[#allocation3 + $0x78] sm:$0xff]  ;;  %v237_v17 = vld [vmem:[#allocation3 + $0xe0] sm:$0xff]  ;;  %v235_v21 = vld [vmem:[#allocation3 + $0xd0] sm:$0xff]  ;;  %p729_p7 = scmp.lt.s32.totalorder %s727_s23, %s723_s22 }
  0x17   :  { %103 = vmatpush1.msra.mxu0 %v52_v7  ;;  %586 = vmatpush3.msra.mxu1 %v224_v12  ;;  %v221_v18 = vld [vmem:[#allocation3 + $0x60] sm:$0xff]  ;;  %v236_v19 = vld [vmem:[#allocation3 + $0xd8] sm:$0xff]  ;;  %v219_v22 = vld [vmem:[#allocation3 + $0x50] sm:$0xff] }
  0x18   :  { %104 = vmatprep.subr.mxu0 %v51_v8  ;;  %587 = vmatprep.subr.mxu1 %v239_v13  ;;  %v220_v20 = vld [vmem:[#allocation3 + $0x58] sm:$0xff]  ;;  %v234_v23 = vld [vmem:[#allocation3 + $0xc8] sm:$0xff]  ;;  %v233_v25 = vld [vmem:[#allocation3 + $0xc0] sm:$0xff]  ;;  %p730_p8 = por %p729_p7, %p728_p6 }
  0x19   :  { %105 = vmatpush1.msra.mxu0 %v50_v9  ;;  %588 = vmatpush3.msra.mxu1 %v223_v14  ;;  %v218_v24 = vld [vmem:[#allocation3 + $0x48] sm:$0xff]  ;;  %v217_v26 = vld [vmem:[#allocation3 + $0x40] sm:$0xff]  ;;  %v232_v27 = vld [vmem:[#allocation3 + $0xb8] sm:$0xff] }
  0x1a   :  { %580 = vmatmul.mubr.msk.f32.vlgmr.msra.gmra.mxu0 %vm70_vm0, %v49_v10  ;;  %639 = vmatprep.subr.mxu0 %v750_v1  ;;  %v216_v28 = vld [vmem:[#allocation3 + $0x38] sm:$0xff]  ;;  %v231_v29 = vld [vmem:[#allocation3 + $0xb0] sm:$0xff]  ;;  %v230_v31 = vld [vmem:[#allocation3 + $0xa8] sm:$0xff]  ;;  %p731_p9 = pnand %p730_p8, %p724_p5 }
  0x1b   :  { %589 = vmatprep.subr.mxu1 %v238_v15  ;;  %v215_v30 = vld [vmem:[#allocation3 + $0x30] sm:$0xff]  ;;  %v214_v32 = vld [vmem:[#allocation3 + $0x28] sm:$0xff]  ;;  %v229_v33 = vld [vmem:[#allocation3 + $0xa0] sm:$0xff]  ;;  %671 = vmatprep.mubr.msk.f32.mxu0 %vm751_vm1, %v750_v1 }
  0x1c   :  { %590 = vmatpush3.msra.mxu1 %v222_v16  ;;  %v213_v34 = vld [vmem:[#allocation3 + $0x20] sm:$0xff]  ;;  %v228_v35 = vld [vmem:[#allocation3 + $0x98] sm:$0xff]  ;;  %v227_v37 = vld [vmem:[#allocation3 + $0x90] sm:$0xff] }
  0x1d   :  { %591 = vmatprep.subr.mxu1 %v237_v17  ;;  %v212_v36 = vld [vmem:[#allocation3 + $0x18] sm:$0xff]  ;;  %v211_v38 = vld [vmem:[#allocation3 + $0x10] sm:$0xff]  ;;  %v226_v39 = vld [vmem:[#allocation3 + $0x88] sm:$0xff] }
  0x1e   :  { %592 = vmatpush3.msra.mxu1 %v221_v18  ;;  %v210_v40 = vld [vmem:[#allocation3 + $0x8] sm:$0xff]  ;;  %v225_v41 = vld [vmem:[#allocation3 + $0x80] sm:$0xff] }
  0x1f   :  { %593 = vmatprep.subr.mxu1 %v236_v19  ;;  %v209_v42 = vld [vmem:[#allocation3] sm:$0xff] }
  0x20   :  { %594 = vmatpush3.msra.mxu1 %v220_v20  ;;  %v58_v46 = vld [vmem:[%s930_s2] sm:$0x3] }
  0x21   :  { %595 = vmatprep.subr.mxu1 %v235_v21  ;;  %v63_v48 = vrot.slane %v58_v46, %v62_v45  ;;  %v67_v49 = vrot.slane %v58_v46, %v66_v47 }
  0x22   :  { %596 = vmatpush3.msra.mxu1 %v219_v22 }
  0x23   :  { %597 = vmatprep.subr.mxu1 %v234_v23 }
  0x24   :  { %598 = vmatpush3.msra.mxu1 %v218_v24 }
  0x25   :  { %599 = vmatprep.subr.mxu1 %v233_v25 }
  0x26   :  { %600 = vmatpush3.msra.mxu1 %v217_v26 }
  0x27   :  { %601 = vmatprep.subr.mxu1 %v232_v27 }
  0x28   :  { %602 = vmatpush3.msra.mxu1 %v216_v28 }
  0x29   :  { %603 = vmatprep.subr.mxu1 %v231_v29 }
  0x2a   :  { %604 = vmatpush3.msra.mxu1 %v215_v30 }
  0x2b   :  { %605 = vmatprep.subr.mxu1 %v230_v31 }
  0x2c   :  { %606 = vmatpush3.msra.mxu1 %v214_v32 }
  0x2d   :  { %607 = vmatprep.subr.mxu1 %v229_v33 }
  0x2e   :  { %608 = vmatpush3.msra.mxu1 %v213_v34 }
  0x2f   :  { %609 = vmatprep.subr.mxu1 %v228_v35 }
  0x30   :  { %610 = vmatpush3.msra.mxu1 %v212_v36 }
  0x31   :  { %611 = vmatprep.subr.mxu1 %v227_v37 }
  0x32   :  { %612 = vmatpush3.msra.mxu1 %v211_v38 }
  0x33   :  { %613 = vmatprep.subr.mxu1 %v226_v39 }
  0x34   :  { %614 = vmatpush3.msra.mxu1 %v210_v40 }
  0x35   :  { %615 = vmatprep.subr.mxu1 %v225_v41 }
  0x36   :  { %616 = vmatpush3.msra.mxu1 %v209_v42 }
  0x37   :  { %674 = vmatprep.subr.mxu1 %v750_v1 }
  0xda   :  { %v140_v50 = vpop.f32.mrf.mxu0 }
  0xdb   :  { %v141_v51 = vadd.f32 %v140_v50, %v63_v48  ;;  %v364_v50 = vld [vmem:[%s933_s5 + $0x70] sm:$0xff] }
  0xdc   :  { %v142_v52 = vpop.f32.mrf.mxu0 }
  0xdd   :  { %v145_v53 = vmul.f32 0.70710677, %v141_v51  ;;  %v143_v54 = vadd.f32 %v142_v52, %v67_v49  ;;  %v203_v46 = vmul.f32 0.5, %v141_v51  ;;  %v365_v49 = vld [vmem:[%s933_s5 + $0x78] sm:$0xff]  ;;  %v363_v51 = vld [vmem:[%s933_s5 + $0x68] sm:$0xff]  ;;  %v362_v52 = vld [vmem:[%s933_s5 + $0x60] sm:$0xff] }
  0xde   :  { %640 = vmatpush3.msra.mxu0 %v365_v49 }
  0xdf   :  { %v149_v55 = vand.u32 2147483647, %v145_v53  ;;  %v146_v56 = vmul.f32 0.70710677, %v143_v54  ;;  %v153_v34 = vand.u32 2147483648, %v145_v53  ;;  %v204_v42 = vmul.f32 0.5, %v143_v54  ;;  %641 = vmatprep.subr.mxu0 %v750_v1 }
  0xe0   :  { %642 = vmatpush3.msra.mxu0 %v364_v50  ;;  %v361_v53 = vld [vmem:[%s933_s5 + $0x58] sm:$0xff]  ;;  %v360_v54 = vld [vmem:[%s933_s5 + $0x50] sm:$0xff] }
  0xe1   :  { %v155_v57 = vmul.f32 0.3275911, %v149_v55  ;;  %v150_v58 = vand.u32 2147483647, %v146_v56  ;;  %v185_v62 = vmul.f32 %v149_v55, %v149_v55  ;;  %v154_v38 = vand.u32 2147483648, %v146_v56  ;;  %643 = vmatprep.subr.mxu0 %v750_v1  ;;  %v359_v55 = vld [vmem:[%s933_s5 + $0x48] sm:$0xff] }
  0xe2   :  { %644 = vmatpush3.msra.mxu0 %v363_v51  ;;  %v358_v56 = vld [vmem:[%s933_s5 + $0x40] sm:$0xff] }
  0xe3   :  { %v157_v59 = vadd.f32 1.0, %v155_v57  ;;  %v156_v60 = vmul.f32 0.3275911, %v150_v58  ;;  %v186_v2 = vmul.f32 %v150_v58, %v150_v58  ;;  %v187_v5 = vsub.f32 0.0, %v185_v62  ;;  %645 = vmatprep.subr.mxu0 %v750_v1  ;;  %v357_v57 = vld [vmem:[%s933_s5 + $0x38] sm:$0xff]  ;;  %v356_v58 = vld [vmem:[%s933_s5 + $0x30] sm:$0xff] }
  0xe4   :  { %646 = vmatpush3.msra.mxu0 %v362_v52  ;;  %v352_v62 = vld [vmem:[%s933_s5 + $0x10] sm:$0xff] }
  0xe5   :  { %687 = vrcp.f32 %v157_v59  ;;  %v158_v61 = vadd.f32 1.0, %v156_v60  ;;  %v188_v9 = vsub.f32 0.0, %v186_v2  ;;  %v189_v10 = vmul.f32 1.442695, %v187_v5  ;;  %647 = vmatprep.subr.mxu0 %v750_v1  ;;  %v354_v60 = vld [vmem:[%s933_s5 + $0x20] sm:$0xff] }
  0xe6   :  { %648 = vmatpush3.msra.mxu0 %v361_v53 }
  0xe7   :  { %689 = vrcp.f32 %v158_v61  ;;  %v191_v14 = vmul.f32 1.442695, %v188_v9  ;;  %649 = vmatprep.subr.mxu0 %v750_v1 }
  0xe8   :  { %691 = vpow2.f32 %v189_v10  ;;  %650 = vmatpush3.msra.mxu0 %v360_v54 }
  0xe9   :  { %693 = vpow2.f32 %v191_v14  ;;  %651 = vmatprep.subr.mxu0 %v750_v1 }
  0xea   :  { %652 = vmatpush3.msra.mxu0 %v359_v55 }
  0xeb   :  { %653 = vmatprep.subr.mxu0 %v750_v1 }
  0xec   :  { %654 = vmatpush3.msra.mxu0 %v358_v56 }
  0xed   :  { %655 = vmatprep.subr.mxu0 %v750_v1 }
  0xee   :  { %656 = vmatpush3.msra.mxu0 %v357_v57 }
  0xef   :  { %657 = vmatprep.subr.mxu0 %v750_v1 }
  0xf0   :  { %658 = vmatpush3.msra.mxu0 %v356_v58 }
  0xf1   :  { %659 = vmatprep.subr.mxu0 %v750_v1 }
  0xf2   :  { %v688_v63 = vpop.eup %687 }
  0xf3   :  { %v161_v0 = vmul.f32 %v688_v63, %v157_v59  ;;  %v355_v59 = vld [vmem:[%s933_s5 + $0x28] sm:$0xff] }
  0xf4   :  { %v690_v3 = vpop.eup %689  ;;  %660 = vmatpush3.msra.mxu0 %v355_v59 }
  0xf5   :  { %v163_v4 = vsub.f32 2.0, %v161_v0  ;;  %v162_v6 = vmul.f32 %v690_v3, %v158_v61  ;;  %v692_v29 = vpop.eup %691  ;;  %661 = vmatprep.subr.mxu0 %v750_v1  ;;  %v353_v61 = vld [vmem:[%s933_s5 + $0x18] sm:$0xff]  ;;  %v350_v0 = vld [vmem:[%s933_s5] sm:$0xff] }
  0xf6   :  { %v694_v33 = vpop.eup %693  ;;  %662 = vmatpush3.msra.mxu0 %v354_v60 }
  0xf7   :  { %v165_v7 = vmul.f32 %v688_v63, %v163_v4  ;;  %v164_v8 = vsub.f32 2.0, %v162_v6  ;;  %663 = vmatprep.subr.mxu0 %v750_v1  ;;  %v351_v63 = vld [vmem:[%s933_s5 + $0x8] sm:$0xff] }
  0xf8   :  { %664 = vmatpush3.msra.mxu0 %v353_v61 }
  0xf9   :  { %v167_v11 = vmul.f32 1.0614054, %v165_v7  ;;  %v166_v12 = vmul.f32 %v690_v3, %v164_v8  ;;  %665 = vmatprep.subr.mxu0 %v750_v1  ;;  %v581_v3 = vld [vmem:[%s932_s4] ss:$0 sm:$0xff] }
  0xfa   :  { %666 = vmatpush3.msra.mxu0 %v352_v62 }
  0xfb   :  { %v169_v13 = vadd.f32 -1.4531521, %v167_v11  ;;  %v168_v15 = vmul.f32 1.0614054, %v166_v12  ;;  %667 = vmatprep.subr.mxu0 %v750_v1 }
  0xfc   :  { %668 = vmatpush3.msra.mxu0 %v351_v63 }
  0xfd   :  { %v171_v16 = vmul.f32 %v169_v13, %v165_v7  ;;  %v170_v17 = vadd.f32 -1.4531521, %v168_v15  ;;  %669 = vmatprep.subr.mxu0 %v750_v1 }
  0xfe   :  { %670 = vmatpush3.msra.mxu0 %v350_v0 }
  0xff   :  { %v173_v18 = vadd.f32 1.4214138, %v171_v16  ;;  %v172_v19 = vmul.f32 %v170_v17, %v166_v12 }
 0x101   :  { %v175_v20 = vmul.f32 %v173_v18, %v165_v7  ;;  %v174_v21 = vadd.f32 1.4214138, %v172_v19 }
 0x103   :  { %v177_v22 = vadd.f32 -0.28449672, %v175_v20  ;;  %v176_v23 = vmul.f32 %v174_v21, %v166_v12 }
 0x105   :  { %v179_v24 = vmul.f32 %v177_v22, %v165_v7  ;;  %v178_v25 = vadd.f32 -0.28449672, %v176_v23 }
 0x107   :  { %v181_v26 = vadd.f32 0.2548296, %v179_v24  ;;  %v180_v27 = vmul.f32 %v178_v25, %v166_v12 }
 0x109   :  { %v183_v28 = vmul.f32 %v181_v26, %v165_v7  ;;  %v182_v30 = vadd.f32 0.2548296, %v180_v27 }
 0x10b   :  { %v193_v31 = vmul.f32 %v692_v29, %v183_v28  ;;  %v184_v32 = vmul.f32 %v182_v30, %v166_v12 }
 0x10d   :  { %v195_v35 = vsub.f32 1.0, %v193_v31  ;;  %v194_v36 = vmul.f32 %v694_v33, %v184_v32 }
 0x10f   :  { %v199_v37 = vor.u32 %v195_v35, %v153_v34  ;;  %v196_v39 = vsub.f32 1.0, %v194_v36  ;;  %v476_v34 = vld [vmem:[#allocation2] sm:$0x1]  ;;  %v752_v35 = vmov 0  }
 0x110   :  { %686 = vset.pattern.permute.xlu0 %v752_v35  ;;  %v582_v36 = vld [vmem:[%s934_s6] ss:$0 sm:$0xff] }
 0x111   :  { %v200_v40 = vor.u32 %v196_v39, %v154_v38  ;;  %v205_v41 = vadd.f32 1.0, %v199_v37  ;;  %479 = vperm.xlu0 %686, %v476_v34  }
 0x113   :  { %v206_v43 = vadd.f32 1.0, %v200_v40  ;;  %v207_v48 = vmul.f32 %v205_v41, %v203_v46 }
 0x115   :  { %v208_v47 = vmul.f32 %v206_v43, %v204_v42 }
 0x117   :  { %312 = vmatprep.mubr.f32.mxu1 %v208_v47 }
 0x118   :  { %313 = vmatmul.mubr.f32.vlgmr.msra.gmra.mxu1 %v207_v48 }
 0x119   :  { %676 = vmatprep.mubr.msk.f32.mxu1 %vm751_vm1, %v750_v1 }
 0x1d8   :  { %v617_v2 = vpop.f32.mrf.mxu1 }
 0x1da   :  { %v618_v4 = vpop.f32.mrf.mxu1 }
 0x1db   :  { %v619_v5 = vadd.f32 %v618_v4, %v617_v2 }
 0x1dd   :  { %v315_v6 = vadd.f32 %v619_v5, %v581_v3 }
 0x1df   :  { %v318_v7 = vmul.f32 0.70710677, %v315_v6  ;;  %v347_v31 = vmul.f32 0.5, %v315_v6 }
 0x1e1   :  { %v320_v8 = vand.u32 2147483647, %v318_v7  ;;  %v322_v28 = vand.u32 2147483648, %v318_v7  ;;  %v475_v7 = vld [vmem:[%s935_s7] sm:$0x1] }
 0x1e3   :  { %v323_v9 = vmul.f32 0.3275911, %v320_v8  ;;  %v338_v11 = vmul.f32 %v320_v8, %v320_v8  ;;  %v480_v8 = vpop.permute.xlu0 %479 }
 0x1e5   :  { %v324_v10 = vadd.f32 1.0, %v323_v9  ;;  %v339_v15 = vsub.f32 0.0, %v338_v11  ;;  %v485_v9 = vrot.slane %v480_v8, %v62_v45 }
 0x1e7   :  { %695 = vrcp.f32 %v324_v10  ;;  %v340_v17 = vmul.f32 1.442695, %v339_v15 }
 0x1e9   :  { %697 = vpow2.f32 %v340_v17 }
 0x1f4   :  { %v696_v12 = vpop.eup %695 }
 0x1f5   :  { %v326_v13 = vmul.f32 %v696_v12, %v324_v10 }
 0x1f6   :  { %v698_v26 = vpop.eup %697 }
 0x1f7   :  { %v327_v14 = vsub.f32 2.0, %v326_v13 }
 0x1f9   :  { %v328_v16 = vmul.f32 %v696_v12, %v327_v14 }
 0x1fb   :  { %v329_v1 = vmul.f32 1.0614054, %v328_v16 }
 0x1fd   :  { %v330_v18 = vadd.f32 -1.4531521, %v329_v1 }
 0x1ff   :  { %v331_v19 = vmul.f32 %v330_v18, %v328_v16 }
 0x201   :  { %v332_v20 = vadd.f32 1.4214138, %v331_v19 }
 0x203   :  { %v333_v21 = vmul.f32 %v332_v20, %v328_v16 }
 0x205   :  { %v334_v22 = vadd.f32 -0.28449672, %v333_v21 }
 0x207   :  { %v335_v23 = vmul.f32 %v334_v22, %v328_v16 }
 0x209   :  { %v336_v24 = vadd.f32 0.2548296, %v335_v23 }
 0x20b   :  { %v337_v25 = vmul.f32 %v336_v24, %v328_v16 }
 0x20d   :  { %v342_v27 = vmul.f32 %v698_v26, %v337_v25 }
 0x20f   :  { %v343_v29 = vsub.f32 1.0, %v342_v27 }
 0x211   :  { %v345_v30 = vor.u32 %v343_v29, %v322_v28 }
 0x213   :  { %v348_v32 = vadd.f32 1.0, %v345_v30 }
 0x215   :  { %v349_v33 = vmul.f32 %v348_v32, %v347_v31 }
 0x217   :  { %672 = vmatmul.mubr.f32.vlgmr.msra.gmra.mxu0 %v349_v33 }
 0x2d7   :  { %v439_v37 = vpop.f32.mrf.mxu0 }
 0x2d8   :  { %v440_v38 = vadd.f32 %v582_v36, %v439_v37 }
 0x2d9   :  { %v673_v39 = vpop.f32.mrf.mxu0 }
 0x2da   :  { %v443_v40 = vmul.f32 0.70710677, %v440_v38  ;;  %v472_v4 = vmul.f32 0.5, %v440_v38 }
 0x2dc   :  { %v445_v41 = vand.u32 2147483647, %v443_v40  ;;  %v447_v0 = vand.u32 2147483648, %v443_v40 }
 0x2de   :  { %v448_v42 = vmul.f32 0.3275911, %v445_v41  ;;  %v463_v46 = vmul.f32 %v445_v41, %v445_v41 }
 0x2e0   :  { %v449_v43 = vadd.f32 1.0, %v448_v42  ;;  %v464_v50 = vsub.f32 0.0, %v463_v46 }
 0x2e2   :  { %699 = vrcp.f32 %v449_v43  ;;  %v465_v53 = vmul.f32 1.442695, %v464_v50 }
 0x2e4   :  { %701 = vpow2.f32 %v465_v53 }
 0x2ef   :  { %v700_v47 = vpop.eup %699 }
 0x2f0   :  { %v451_v48 = vmul.f32 %v700_v47, %v449_v43 }
 0x2f1   :  { %v702_v62 = vpop.eup %701 }
 0x2f2   :  { %v452_v49 = vsub.f32 2.0, %v451_v48 }
 0x2f4   :  { %v453_v51 = vmul.f32 %v700_v47, %v452_v49 }
 0x2f6   :  { %v454_v52 = vmul.f32 1.0614054, %v453_v51 }
 0x2f8   :  { %v455_v54 = vadd.f32 -1.4531521, %v454_v52 }
 0x2fa   :  { %v456_v55 = vmul.f32 %v455_v54, %v453_v51 }
 0x2fc   :  { %v457_v56 = vadd.f32 1.4214138, %v456_v55 }
 0x2fe   :  { %v458_v57 = vmul.f32 %v457_v56, %v453_v51 }
 0x300   :  { %v459_v58 = vadd.f32 -0.28449672, %v458_v57 }
 0x302   :  { %v460_v59 = vmul.f32 %v459_v58, %v453_v51 }
 0x304   :  { %v461_v60 = vadd.f32 0.2548296, %v460_v59 }
 0x306   :  { %v462_v61 = vmul.f32 %v461_v60, %v453_v51 }
 0x308   :  { %v467_v63 = vmul.f32 %v702_v62, %v462_v61 }
 0x30a   :  { %v468_v2 = vsub.f32 1.0, %v467_v63 }
 0x30c   :  { %v470_v3 = vor.u32 %v468_v2, %v447_v0 }
 0x30e   :  { %v473_v5 = vadd.f32 1.0, %v470_v3 }
 0x310   :  { %v474_v6 = vmul.f32 %v473_v5, %v472_v4 }
 0x312   :  { %675 = vmatpush3.xpose.msk.msra.mxu1 %vm486_vm2, %v474_v6 }
 0x315   :  { %677 = vmatmul.mubr.msk.f32.vlgmr.msra.gmra.mxu1 %vm486_vm2, %v475_v7 }
 0x3d5   :  { %v559_v10 = vpop.f32.mrf.mxu1 }
 0x3d6   :  { %v560_v11 = vadd.f32 %v559_v10, %v485_v9 }
 0x3d7   :  { %v678_v12 = vpop.f32.mrf.mxu1 }
 0x3d8   :  { %564 = vst.msk [vmem:[#allocation6] sm:$0x1] %vm563_vm3, %v560_v11 }
 0x3d9   :  { %734 = shalt.err (!%p731_p9)
}
 0x3da   :  { %574 = dma.vmem_to_hbm [thread:$0]  %s572_s21, 16, %s937_s9, [#allocation5]  }
 0x3db   :  { %745 = dma.done.wait [#allocation5], 16  }
 0x3dc   :  { %746 = vsyncadd [#allocation5], 4294967280 }
 0x3dd   :  { %578 = vsyncpa [#allocation4], 1 }
 0x3de   :  { %579 = vsyncpa [#allocation5], 1 }

</bundles_post_ra>
